<compile_context>
chip_gen: v7x
topology: tpu7x:2x2x1
jax: 0.10.0
libtpu: 0.0.40
codegen_flags: <defaults>
</compile_context>

<pallas_src>
import functools

import jax
import jax.numpy as jnp
from jax.experimental import pallas as pl
from jax.experimental.pallas import tpu as pltpu


# ----------------------------------------------------------------------------
# Hyper-parameters consistent with the module (small shapes)
# ----------------------------------------------------------------------------
B = 2           # batch of user indices
USER_NUM = 12   # args.user_num
E = 32          # args.embedding_dim
QD = 32         # args.query_vector_dim


# ----------------------------------------------------------------------------
# Fused kernel: one-hot embedding gather -> [fc1|fc2] matmul -> bias -> ReLU
# ----------------------------------------------------------------------------
def user_embed_kernel(idx_ref, table_ref, w_ref, b_ref, o_ref):
    """idx_ref   : [B, 1]     int32  user indices
       table_ref : [U, E]     bf16   user-embedding table
       w_ref     : [E, 2*QD]  bf16   fc1 and fc2 weights concatenated along N
       b_ref     : [1, 2*QD]  f32    fc1 and fc2 biases concatenated
       o_ref     : [B, 2*QD]  f32    [user_vector | user_vector_2]
    """
    b = idx_ref.shape[0]
    u = table_ref.shape[0]

    # In-kernel embedding gather as a batched one-hot MXU dot.  Exact: each
    # row of the one-hot has a single 1, so the result equals the bf16 table
    # rows (same values the fc dot would consume after a cast anyway).
    lane_ids = jax.lax.broadcasted_iota(jnp.int32, (b, u), dimension=1)
    onehot = (lane_ids == idx_ref[...]).astype(jnp.bfloat16)          # [B, U]
    emb = jnp.dot(onehot, table_ref[...],
                  preferred_element_type=jnp.float32)                 # [B, E]

    # Fused fc1|fc2: one lane-dense N=64 dot, f32 accumulation, f32 epilogue.
    h = jnp.dot(emb.astype(jnp.bfloat16), w_ref[...],
                preferred_element_type=jnp.float32) + b_ref[...]      # [B, 2*QD]
    o_ref[...] = jnp.maximum(h, 0.0).astype(o_ref.dtype)


def user_embedding_encoder_pallas(user_index, user_embedding,
                                  fc1_w, fc1_b, fc2_w, fc2_b):
    """Returns (user_vector, user_vector_2), each [B, QD] float32."""
    b = user_index.shape[0]
    _, qd = fc1_w.shape

    # Parameter prep (constant-folds under jit when params are closure consts).
    w_fused = jnp.concatenate([fc1_w, fc2_w], axis=1).astype(jnp.bfloat16)  # [E, 2*QD]
    b_fused = jnp.concatenate([fc1_b, fc2_b], axis=0)[None, :]              # [1, 2*QD]
    idx = user_index.astype(jnp.int32).reshape(b, 1)

    vmem = pl.BlockSpec(memory_space=pltpu.MemorySpace.VMEM)
    out = pl.pallas_call(
        user_embed_kernel,
        out_shape=jax.ShapeDtypeStruct((b, 2 * qd), jnp.float32),
        in_specs=[vmem, vmem, vmem, vmem],
        out_specs=vmem,
    )(idx, user_embedding.astype(jnp.bfloat16), w_fused, b_fused)

    return out[:, :qd], out[:, qd:]


# ----------------------------------------------------------------------------
# Deterministic parameter construction + forward glue
# ----------------------------------------------------------------------------
def make_params(key):
    ks = jax.random.split(key, 5)
    bound = 1.0 / jnp.sqrt(jnp.float32(E))   # PyTorch Linear default init range
    return {
        "user_embedding": jax.random.normal(ks[0], (USER_NUM, E), jnp.float32) * 0.1,
        "fc1_w": jax.random.uniform(ks[1], (E, QD), jnp.float32, -bound, bound),
        "fc1_b": jax.random.uniform(ks[2], (QD,), jnp.float32, -bound, bound),
        "fc2_w": jax.random.uniform(ks[3], (E, QD), jnp.float32, -bound, bound),
        "fc2_b": jax.random.uniform(ks[4], (QD,), jnp.float32, -bound, bound),
    }


def forward(params, user_index):
    return user_embedding_encoder_pallas(
        user_index, params["user_embedding"],
        params["fc1_w"], params["fc1_b"], params["fc2_w"], params["fc2_b"])


if __name__ == "__main__":
    key = jax.random.PRNGKey(0)
    kp, ki = jax.random.split(key)
    params = make_params(kp)
    user_index = jax.random.randint(ki, (B,), 0, USER_NUM)

    fwd = jax.jit(functools.partial(forward, params))
    user_vector, user_vector_2 = fwd(user_index)
    jax.block_until_ready((user_vector, user_vector_2))

    # Pure-JAX f32 reference; loose tolerance because MXU operands are bf16.
    emb = params["user_embedding"][user_index]
    ref1 = jnp.maximum(emb @ params["fc1_w"] + params["fc1_b"], 0.0)
    ref2 = jnp.maximum(emb @ params["fc2_w"] + params["fc2_b"], 0.0)

    assert user_vector.shape == (B, QD), user_vector.shape
    assert user_vector_2.shape == (B, QD), user_vector_2.shape
    assert bool(jnp.all(jnp.isfinite(user_vector)))
    assert bool(jnp.all(jnp.isfinite(user_vector_2)))
    err = max(float(jnp.max(jnp.abs(user_vector - ref1))),
              float(jnp.max(jnp.abs(user_vector_2 - ref2))))
    assert err < 5e-2, f"max abs error vs f32 reference: {err}"
    print("KERNEL_OK")
</pallas_src>

<mosaic_0001>
module attributes {stable_mosaic.version = 11 : i64} {
  func.func @user_embed_kernel(%arg0: memref<2x1xi32, #tpu.memory_space<vmem>>, %arg1: memref<12x32xbf16, #tpu.memory_space<vmem>>, %arg2: memref<32x64xbf16, #tpu.memory_space<vmem>>, %arg3: memref<1x64xf32, #tpu.memory_space<vmem>>, %arg4: memref<2x64xf32, #tpu.memory_space<vmem>>) attributes {dimension_semantics = [], scalar_prefetch = 0 : i64, scratch_operands = 0 : i64, tpu.core_type = #tpu.core_type<tc>} {
    %0 = tpu.iota {dimensions = array<i32: 1>} : vector<2x12xi32>
    %c0 = arith.constant 0 : index
    %c0_0 = arith.constant 0 : index
    %1 = vector.load %arg0[%c0, %c0_0] : memref<2x1xi32, #tpu.memory_space<vmem>>, vector<2x1xi32>
    %2 = vector.broadcast %1 : vector<2x1xi32> to vector<2x12xi32>
    %3 = arith.cmpi eq, %0, %2 : vector<2x12xi32>
    %4 = arith.extui %3 : vector<2x12xi1> to vector<2x12xi32>
    %5 = arith.sitofp %4 : vector<2x12xi32> to vector<2x12xf32>
    %6 = arith.truncf %5 : vector<2x12xf32> to vector<2x12xbf16>
    %c0_1 = arith.constant 0 : index
    %c0_2 = arith.constant 0 : index
    %7 = vector.load %arg1[%c0_1, %c0_2] : memref<12x32xbf16, #tpu.memory_space<vmem>>, vector<12x32xbf16>
    %cst = arith.constant dense<0.000000e+00> : vector<2x32xf32>
    %8 = tpu.matmul %6, %7, %cst {dimension_numbers = #tpu.dot_dimension_numbers<[1], [0], [0], [1], [0, 0, 1, 1], [], []>} : vector<2x12xbf16>, vector<12x32xbf16>, vector<2x32xf32> -> vector<2x32xf32>
    %9 = arith.truncf %8 : vector<2x32xf32> to vector<2x32xbf16>
    %c0_3 = arith.constant 0 : index
    %c0_4 = arith.constant 0 : index
    %10 = vector.load %arg2[%c0_3, %c0_4] : memref<32x64xbf16, #tpu.memory_space<vmem>>, vector<32x64xbf16>
    %cst_5 = arith.constant dense<0.000000e+00> : vector<2x64xf32>
    %11 = tpu.matmul %9, %10, %cst_5 {dimension_numbers = #tpu.dot_dimension_numbers<[1], [0], [0], [1], [0, 0, 1, 1], [], []>} : vector<2x32xbf16>, vector<32x64xbf16>, vector<2x64xf32> -> vector<2x64xf32>
    %c0_6 = arith.constant 0 : index
    %c0_7 = arith.constant 0 : index
    %12 = vector.load %arg3[%c0_6, %c0_7] : memref<1x64xf32, #tpu.memory_space<vmem>>, vector<1x64xf32>
    %13 = vector.broadcast %12 : vector<1x64xf32> to vector<2x64xf32>
    %14 = arith.addf %11, %13 : vector<2x64xf32>
    %cst_8 = arith.constant 0.000000e+00 : f32
    %15 = vector.broadcast %cst_8 : f32 to vector<2x64xf32>
    %16 = arith.maximumf %14, %15 : vector<2x64xf32>
    %c0_9 = arith.constant 0 : index
    %c0_10 = arith.constant 0 : index
    %17 = vector.load %arg4[%c0_9, %c0_10] : memref<2x64xf32, #tpu.memory_space<vmem>>, vector<2x64xf32>
    tpu.vector_store %arg4[%c0_9, %c0_10], %16 {strides = array<i32>} : memref<2x64xf32, #tpu.memory_space<vmem>>, vector<2x64xf32>,
    return
  }
}

</mosaic_0001>

<bundles_post_ra>
// kernel: forward.1
= control target key start
LH: loop header
LB: loop body
LE: loop exit
PB: predicated region body
PF: predicated region fallthrough
CT: control target
= control target key end

     0   :  { %9 = vsyncpa [#allocation3], 0  ;;  %s233_s15 = smov [#allocation2]   ;;  %s291_s0 = inlined_call_operand.vmem [shape: s32[2,1], index: 0, kind: input, shape index: {}]   ;;  %s292_s1 = inlined_call_operand.hbm [shape: bf16[12,32], index: 1, kind: input, shape index: {}]   ;;  %s293_s2 = inlined_call_operand.vmem [shape: bf16[32,64], index: 2, kind: input, shape index: {}]   ;;  %s294_s3 = inlined_call_operand.vmem [shape: f32[1,64], index: 3, kind: input, shape index: {}]   ;;  %s295_s4 = inlined_call_operand.vmem [shape: f32[2,64], index: 4, kind: output, shape index: {}]  }
   0x1   :  { %s17_s16 = sshll.u32 %s233_s15, 4  ;;  %s209_s19 = scalar_lea.hbm %s292_s1, 128  ;;  %s18_s16 = int_to_ptr.vmem [resolvable:$true] %s17_s16 }
   0x2   :  { %p210_p0 = scmp.ne.s32.totalorder %s292_s1, %s209_s19  ;;  %p213_p1 = scmp.lt.u32.totalorder %s209_s19, %s292_s1 }
   0x4   :  { %p215_p2 = pnand %p213_p1, %p210_p0 }
   0x6   :  { %218 = shalt.err (!%p215_p2)
}
   0x7   :  { %s219_s24 = scalar_lea.vmem %s18_s16, 128  ;;  %p224_p4 = scmp.lt.s32.totalorder %s18_s16, %s18_s16 }
   0x8   :  { %p220_p3 = scmp.ne.s32.totalorder %s18_s16, %s219_s24  ;;  %p225_p5 = scmp.lt.s32.totalorder %s219_s24, %s219_s24 }
   0xa   :  { %p226_p6 = por %p225_p5, %p224_p4 }
   0xc   :  { %p227_p7 = pnand %p226_p6, %p220_p3 }
   0xe   :  { %230 = shalt.err (!%p227_p7)
}
   0xf   :  { %s234_s25 = smov 64   ;;  %s235_s26 = smov 4  }
  0x10   :  { %23 = dma.hbm_to_vmem [thread:$0]  %s292_s1, 128, %s18_s16, [#allocation3], %s234_s25, %s234_s25, %s235_s26  }
  0x11   :  { %231 = dma.done.wait [#allocation3], 128  }
  0x12   :  { %232 = vsyncadd [#allocation3], 4294967168  ;;  %v236_v0 = vmov 0   ;;  %v237_v1 = vmov 0.0   ;;  %v34_v2 = vld [vmem:[%s291_s0] sm:$0x3]  ;;  %v32_v6 = vlaneseq }
  0x13   :  { %205 = vset.pattern.permute.xlu0 %v236_v0  ;;  %185 = vmatprep.subr.bf16.mxu0 %v237_v1  ;;  %v206_v3 = vld [vmem:[#allocation2] sm:$0x3f]   ;;  %vm53_vm0 = vcmask 1045504   ;;  %vm238_vm1 = vmmov 0   ;;  %vm49_vm3 = vcmask 97280   ;;  %v208_v11 = vld [vmem:[%s293_s2 + $0x8] sm:$0xff]  }
  0x14   :  { %191 = vmatprep.subr.bf16.mxu1 %v237_v1  ;;  %36 = vperm.xlu0 %205, %v34_v2   ;;  %v55_v4 = vsel %vm53_vm0, %v206_v3, 0  ;;  %v207_v5 = vld [vmem:[%s293_s2] sm:$0xff]   ;;  %v33_v7 = vand.u32 127, %v32_v6  ;;  %vm121_vm4 = vcmask 261120   ;;  %vm166_vm5 = vcmask 517120  }
  0x15   :  { %186 = vmatpush3.bf16.msra.mxu0 %v55_v4  ;;  %187 = vmatprep.mubr.msk.bf16.mxu0 %vm238_vm1, %v237_v1  ;;  %v176_v17 = vld [vmem:[%s294_s3] ss:$0 sm:$0xff] }
  0x16   :  { %195 = vmatprep.mubr.msk.bf16.mxu1 %vm238_vm1, %v237_v1  ;;  %192 = vmatpush3.bf16.msra.mxu1 %v207_v5 }
  0x17   :  { %193 = vmatprep.subr.bf16.mxu1 %v237_v1 }
  0x1a   :  { %194 = vmatpush3.bf16.msra.mxu1 %v208_v11 }
  0x93   :  { %v37_v8 = vpop.permute.xlu0 %36 }
  0x94   :  { %vm38_vm2 = vcmp.eq.s32.totalorder %v33_v7, %v37_v8 }
  0x95   :  { %v173_v9 = vsel %vm38_vm2, 1.0, %v237_v1 }
  0x96   :  { %v41_v10 = vpack.c.bf16 %v173_v9, %v173_v9 }
  0x98   :  { %188 = vmatmul.mubr.msk.bf16.vlgmr.msra.gmra.mrb[0].mxu0 %vm49_vm3, %v41_v10 }
 0x16b   :  { %v91_v12 = vpop.f32.mrb[0].mxu0 }
 0x16c   :  { %v97_v13 = vpack.c.bf16 %v91_v12, %v91_v12  ;;  %v189_v14 = vpop.f32.mrb[1].mxu0 }
 0x16d   :  { %v94_v15 = vpop.f32.mrb[2].mxu0 }
 0x16e   :  { %v190_v16 = vpop.f32.mrb[3].mxu0  ;;  %196 = vmatmul.mubr.msk.bf16.vlgmr.msra.gmra.mrb[0].mxu1 %vm121_vm4, %v97_v13 }
 0x241   :  { %v159_v18 = vpop.f32.mrb[0].mxu1 }
 0x242   :  { %v160_v19 = vadd.f32 %v176_v17, %v159_v18  ;;  %v197_v20 = vpop.f32.mrb[1].mxu1 }
 0x243   :  { %v162_v21 = vpop.f32.mrb[2].mxu1 }
 0x244   :  { %v165_v22 = vmax.f32 %v160_v19, 0.0  ;;  %v198_v23 = vpop.f32.mrb[3].mxu1 }
 0x246   :  { %167 = vst.msk [vmem:[%s295_s4] sm:$0x3] %vm166_vm5, %v165_v22 }
 0x247   :  { %172 = vsyncpa [#allocation3], 1 }

</bundles_post_ra>
